<compile_context>
chip_gen: v5e
topology: v5e:2x2
jax: 0.10.0
libtpu: 0.0.40
codegen_flags: <defaults>
</compile_context>

<pallas_src>
import jax
import jax.numpy as jnp
from jax.experimental import pallas as pl
from jax.experimental.pallas import tpu as pltpu


# ---------------------------------------------------------------------------
# Fused kernel: shared trunk + coalesced connect matmul + sampled/actual
# advantage heads + contiguous group segment sum + coalesced head projection.
# ---------------------------------------------------------------------------
def _fused_sdn_kernel(states_ref, actions_ref, u2_ref,
                      w_sh_ref, b_sh_ref,
                      w_con_ref, b_con_ref, w_u_ref,
                      w_heads_ref, b_heads_ref,
                      q_ref,
                      t_scr):
    f32 = jnp.float32
    B = states_ref.shape[0]
    NA = u2_ref.shape[0]
    H = w_sh_ref.shape[1]

    # ---- shared trunk: tanh(states @ W_s + b_s) ----
    shared = jnp.tanh(
        jnp.dot(states_ref[...], w_sh_ref[...], preferred_element_type=f32)
        + b_sh_ref[...])                                            # [B, H]

    # ---- ONE matmul feeds both v_connect and the linear part of a_connect ----
    # w_con = [w_vcon | w_acon[:H]]  (fused on host), N = 2H fits one MXU tile.
    conn = (jnp.dot(shared, w_con_ref[...], preferred_element_type=f32)
            + b_con_ref[...])                                       # [B, 2H]
    v_h = jnp.tanh(conn[:, 0:H])                                    # [B, H]
    base = conn[:, H:2 * H]                                         # [B, H]

    # a_connect split by linearity: [x, a] @ W = x @ W[:H] + a * W[H]
    w_u = w_u_ref[...]                                              # [1, H]

    # advantage hidden activation for the actual actions
    h_a = jnp.tanh(base + actions_ref[...] * w_u)                   # [B, H]

    # ---- sampled-action activations, never materializing [NA*B, H+1] ----
    # u2[r, c] = u_vals.view(-1)[r*B + c] pairs with shared row c — exactly
    # torch's repeat([NA,1]) / view(-1,1) pairing (flat row k = r*B + c).
    u2 = u2_ref[...]                                                # [NA, B]
    t_u = jnp.tanh(base[None, :, :]
                   + u2[:, :, None] * w_u[None, :, :])              # [NA, B, H]
    # flat-order-preserving collapse: scratch row k = r*B + c
    t_scr[...] = t_u.reshape(NA * B, H)                             # [NA*B, H]

    # ---- grouped sum over k // NA (torch outp.view(-1, NA).sum(1)) ----
    # Group g owns flat rows [g*NA, (g+1)*NA).  Accumulate NA strided slices:
    # slice j picks rows {g*NA + j : g = 0..B-1}, i.e. element j of every
    # group, already in group order.  No O(B^2) mask, no MXU contraction.
    acc = jnp.zeros((B, H), f32)
    for j in range(NA):                                             # static unroll (NA = 20)
        acc = acc + t_scr[pl.ds(j, B, stride=NA), :]
    t_mean = acc * (1.0 / NA)                                       # [B, H]

    # ---- coalesced head projection: [v_h ; h_a ; t_mean] @ [w_vnet | w_anet] ----
    heads = jnp.concatenate([v_h, h_a, t_mean], axis=0)             # [3B, H]
    proj = (jnp.dot(heads, w_heads_ref[...], preferred_element_type=f32)
            + b_heads_ref[...])                                     # [3B, 2]

    v_val = proj[0:B, 0:1]           # col 0 (+ b_vnet), rows 0:B
    a_val = proj[B:2 * B, 1:2]       # col 1 (+ b_anet), rows B:2B
    a_mean = proj[2 * B:3 * B, 1:2]  # col 1 (+ b_anet), rows 2B:3B
    # NOTE: [B,1] output keeps torch layout (masked 1-lane stores; reviewed as
    # low priority / negligible).
    q_ref[...] = (a_val - a_mean) + v_val


def _vmem_limit_bytes(B, SD, H, NA):
    """Scoped-VMEM budget sized to the actual (lane/sublane padded) intermediates."""
    def padded(r, c):
        return (-(-r // 8) * 8) * (-(-c // 128) * 128) * 4          # f32 bytes
    est = (
        2 * padded(NA * B, H)                       # t_u value + flat scratch
        + padded(B, SD) + padded(NA, B) + 2 * padded(B, 1)
        + 8 * padded(B, H) + padded(B, 2 * H)
        + padded(3 * B, H) + padded(3 * B, 2)
        + padded(SD, H) + padded(H, 2 * H) + padded(H, 2)
        + 4 * padded(1, H) + 2 * padded(1, 2)
    )
    est = 2 * est + (4 << 20)                       # compiler temporaries / headroom
    # clamp: >= default scoped limit everywhere, <= v7x physical VMEM
    return int(min(64 << 20, max(32 << 20, est)))


# ---------------------------------------------------------------------------
# Wrapper.  Host-side work is only (a) a free row-major reshape of u_vals and
# (b) one-time fusion of weight matrices (weights-only, tiny, jit-able).
# ---------------------------------------------------------------------------
def stochastic_dueling_forward(states, actions, u_vals, params):
    B, SD = states.shape
    NA = u_vals.shape[1]
    H = params["w_shared"].shape[1]

    # free bitcast reshape: u2[r, c] == u_vals.reshape(-1)[r*B + c]
    u2 = u_vals.reshape(NA, B)

    # fused weights (could be precomputed once at parameter-build time)
    w_con = jnp.concatenate([params["w_vcon"], params["w_acon"][0:H, :]], axis=1)   # [H, 2H]
    b_con = jnp.concatenate([params["b_vcon"], params["b_acon"]], axis=1)           # [1, 2H]
    w_u = params["w_acon"][H:H + 1, :]                                              # [1, H]
    w_heads = jnp.concatenate([params["w_vnet"], params["w_anet"]], axis=1)         # [H, 2]
    b_heads = jnp.concatenate([params["b_vnet"], params["b_anet"]], axis=1)         # [1, 2]

    vmem = lambda: pl.BlockSpec(memory_space=pltpu.MemorySpace.VMEM)

    return pl.pallas_call(
        _fused_sdn_kernel,
        out_shape=jax.ShapeDtypeStruct((B, 1), jnp.float32),
        in_specs=[vmem() for _ in range(10)],
        out_specs=pl.BlockSpec(memory_space=pltpu.MemorySpace.VMEM),
        scratch_shapes=[pltpu.VMEM((NA * B, H), jnp.float32)],
        compiler_params=pltpu.CompilerParams(
            vmem_limit_bytes=_vmem_limit_bytes(B, SD, H, NA)),
    )(
        states, actions, u2,
        params["w_shared"], params["b_shared"],
        w_con, b_con, w_u,
        w_heads, b_heads,
    )


# ---------------------------------------------------------------------------
# Pure-JAX reference mirroring the PyTorch forward exactly (for verification).
# ---------------------------------------------------------------------------
def reference_forward(states, actions, u_vals, p):
    shared = jnp.tanh(states @ p["w_shared"] + p["b_shared"])
    # v path
    v_in = jnp.tanh(shared @ p["w_vcon"] + p["b_vcon"])
    v_val = v_in @ p["w_vnet"] + p["b_vnet"]
    # a path (sampled actions), exact torch repeat/view semantics
    NA = u_vals.shape[1]
    rep_shared = jnp.tile(shared, (NA, 1))
    u_vec = u_vals.reshape(-1, 1)
    adv_in = jnp.concatenate([rep_shared, u_vec], axis=1)
    outp = jnp.tanh(adv_in @ p["w_acon"] + p["b_acon"]) @ p["w_anet"] + p["b_anet"]
    outp = outp.reshape(-1, NA)
    a_mean = (jnp.sum(outp, axis=1) / NA).reshape(-1, 1)
    # a path (actual actions)
    adv_in2 = jnp.concatenate([shared, actions], axis=1)
    a_vals = jnp.tanh(adv_in2 @ p["w_acon"] + p["b_acon"]) @ p["w_anet"] + p["b_anet"]
    return (a_vals - a_mean) + v_val


def _xavier_uniform(key, fan_in, fan_out):
    limit = jnp.sqrt(6.0 / (fan_in + fan_out))
    return jax.random.uniform(
        key, (fan_in, fan_out), minval=-limit, maxval=limit, dtype=jnp.float32
    )


def init_params(key, sd, h):
    ks = jax.random.split(key, 5)
    return {
        # shared_net: Linear(sd, H) + tanh   (layer_norm configured off)
        "w_shared": _xavier_uniform(ks[0], sd, h),
        "b_shared": jnp.zeros((1, h), jnp.float32),
        # v_connect: Linear(H, H)
        "w_vcon": _xavier_uniform(ks[1], h, h),
        "b_vcon": jnp.zeros((1, h), jnp.float32),
        # v_net: Linear(H, 1)
        "w_vnet": _xavier_uniform(ks[2], h, 1),
        "b_vnet": jnp.zeros((1, 1), jnp.float32),
        # a_connect: Linear(H + 1, H)
        "w_acon": _xavier_uniform(ks[3], h + 1, h),
        "b_acon": jnp.zeros((1, h), jnp.float32),
        # adv_net: Linear(H, 1)
        "w_anet": _xavier_uniform(ks[4], h, 1),
        "b_anet": jnp.zeros((1, 1), jnp.float32),
    }


if __name__ == "__main__":
    B, SD, H, NA = 8, 16, 32, 20

    root = jax.random.PRNGKey(0)
    k_p, k_s, k_a, k_u = jax.random.split(root, 4)

    params = init_params(k_p, SD, H)
    states = jax.random.normal(k_s, (B, SD), dtype=jnp.float32)
    actions = jax.random.normal(k_a, (B, 1), dtype=jnp.float32)
    # TODO(synk): policy.sample_actions is an external stochastic policy; it is
    # replaced here by a deterministic precomputed sample tensor u_vals.
    u_vals = jax.random.normal(k_u, (B, NA), dtype=jnp.float32)

    q = stochastic_dueling_forward(states, actions, u_vals, params)
    q = jax.block_until_ready(q)

    q_ref = reference_forward(states, actions, u_vals, params)
    assert q.shape == (B, 1)
    assert jnp.all(jnp.isfinite(q))
    assert jnp.allclose(q, q_ref, rtol=2e-3, atol=2e-3), (q, q_ref)

    print("KERNEL_OK")
</pallas_src>

<mosaic_0001>
module attributes {stable_mosaic.version = 11 : i64} {
  func.func @_fused_sdn_kernel(%arg0: memref<8x16xf32, #tpu.memory_space<vmem>>, %arg1: memref<8x1xf32, #tpu.memory_space<vmem>>, %arg2: memref<20x8xf32, #tpu.memory_space<vmem>>, %arg3: memref<16x32xf32, #tpu.memory_space<vmem>>, %arg4: memref<1x32xf32, #tpu.memory_space<vmem>>, %arg5: memref<32x64xf32, #tpu.memory_space<vmem>>, %arg6: memref<1x64xf32, #tpu.memory_space<vmem>>, %arg7: memref<1x32xf32, #tpu.memory_space<vmem>>, %arg8: memref<32x2xf32, #tpu.memory_space<vmem>>, %arg9: memref<1x2xf32, #tpu.memory_space<vmem>>, %arg10: memref<8x1xf32, #tpu.memory_space<vmem>>, %arg11: memref<160x32xf32, #tpu.memory_space<vmem>>) attributes {dimension_semantics = [], scalar_prefetch = 0 : i64, scratch_operands = 1 : i64, tpu.core_type = #tpu.core_type<tc>} {
    %c0 = arith.constant 0 : index
    %c0_0 = arith.constant 0 : index
    %0 = vector.load %arg0[%c0, %c0_0] : memref<8x16xf32, #tpu.memory_space<vmem>>, vector<8x16xf32>
    %c0_1 = arith.constant 0 : index
    %c0_2 = arith.constant 0 : index
    %1 = vector.load %arg3[%c0_1, %c0_2] : memref<16x32xf32, #tpu.memory_space<vmem>>, vector<16x32xf32>
    %cst = arith.constant dense<0.000000e+00> : vector<8x32xf32>
    %2 = tpu.matmul %0, %1, %cst {dimension_numbers = #tpu.dot_dimension_numbers<[1], [0], [0], [1], [0, 0, 1, 1], [], []>} : vector<8x16xf32>, vector<16x32xf32>, vector<8x32xf32> -> vector<8x32xf32>
    %c0_3 = arith.constant 0 : index
    %c0_4 = arith.constant 0 : index
    %3 = vector.load %arg4[%c0_3, %c0_4] : memref<1x32xf32, #tpu.memory_space<vmem>>, vector<1x32xf32>
    %4 = vector.broadcast %3 : vector<1x32xf32> to vector<8x32xf32>
    %5 = arith.addf %2, %4 : vector<8x32xf32>
    %6 = math.tanh %5 : vector<8x32xf32>
    %c0_5 = arith.constant 0 : index
    %c0_6 = arith.constant 0 : index
    %7 = vector.load %arg5[%c0_5, %c0_6] : memref<32x64xf32, #tpu.memory_space<vmem>>, vector<32x64xf32>
    %cst_7 = arith.constant dense<0.000000e+00> : vector<8x64xf32>
    %8 = tpu.matmul %6, %7, %cst_7 {dimension_numbers = #tpu.dot_dimension_numbers<[1], [0], [0], [1], [0, 0, 1, 1], [], []>} : vector<8x32xf32>, vector<32x64xf32>, vector<8x64xf32> -> vector<8x64xf32>
    %c0_8 = arith.constant 0 : index
    %c0_9 = arith.constant 0 : index
    %9 = vector.load %arg6[%c0_8, %c0_9] : memref<1x64xf32, #tpu.memory_space<vmem>>, vector<1x64xf32>
    %10 = vector.broadcast %9 : vector<1x64xf32> to vector<8x64xf32>
    %11 = arith.addf %8, %10 : vector<8x64xf32>
    %12 = vector.extract_strided_slice %11 {offsets = [0, 0], sizes = [8, 32], strides = [1, 1]} : vector<8x64xf32> to vector<8x32xf32>
    %13 = math.tanh %12 : vector<8x32xf32>
    %14 = vector.extract_strided_slice %11 {offsets = [0, 32], sizes = [8, 32], strides = [1, 1]} : vector<8x64xf32> to vector<8x32xf32>
    %c0_10 = arith.constant 0 : index
    %c0_11 = arith.constant 0 : index
    %15 = vector.load %arg7[%c0_10, %c0_11] : memref<1x32xf32, #tpu.memory_space<vmem>>, vector<1x32xf32>
    %c0_12 = arith.constant 0 : index
    %c0_13 = arith.constant 0 : index
    %16 = vector.load %arg1[%c0_12, %c0_13] : memref<8x1xf32, #tpu.memory_space<vmem>>, vector<8x1xf32>
    %17 = vector.broadcast %16 : vector<8x1xf32> to vector<8x32xf32>
    %18 = vector.broadcast %15 : vector<1x32xf32> to vector<8x32xf32>
    %19 = arith.mulf %17, %18 : vector<8x32xf32>
    %20 = arith.addf %14, %19 : vector<8x32xf32>
    %21 = math.tanh %20 : vector<8x32xf32>
    %c0_14 = arith.constant 0 : index
    %c0_15 = arith.constant 0 : index
    %22 = vector.load %arg2[%c0_14, %c0_15] : memref<20x8xf32, #tpu.memory_space<vmem>>, vector<20x8xf32>
    %23 = vector.shape_cast %14 : vector<8x32xf32> to vector<1x8x32xf32>
    %24 = vector.shape_cast %22 : vector<20x8xf32> to vector<20x8x1xf32>
    %25 = vector.shape_cast %15 : vector<1x32xf32> to vector<1x1x32xf32>
    %26 = vector.broadcast %24 : vector<20x8x1xf32> to vector<20x8x32xf32>
    %27 = vector.broadcast %25 : vector<1x1x32xf32> to vector<20x8x32xf32>
    %28 = arith.mulf %26, %27 : vector<20x8x32xf32>
    %29 = vector.broadcast %23 : vector<1x8x32xf32> to vector<20x8x32xf32>
    %30 = arith.addf %29, %28 : vector<20x8x32xf32>
    %31 = math.tanh %30 : vector<20x8x32xf32>
    %32 = vector.shape_cast %31 : vector<20x8x32xf32> to vector<160x32xf32>
    %c0_16 = arith.constant 0 : index
    %c0_17 = arith.constant 0 : index
    %33 = vector.load %arg11[%c0_16, %c0_17] : memref<160x32xf32, #tpu.memory_space<vmem>>, vector<160x32xf32>
    tpu.vector_store %arg11[%c0_16, %c0_17], %32 {strides = array<i32>} : memref<160x32xf32, #tpu.memory_space<vmem>>, vector<160x32xf32>,
    %cst_18 = arith.constant 0.000000e+00 : f32
    %34 = vector.broadcast %cst_18 : f32 to vector<8x32xf32>
    %c0_19 = arith.constant 0 : index
    %c0_20 = arith.constant 0 : index
    %35 = tpu.strided_load %arg11[%c0_19, %c0_20] {strides = array<i32: 20, 1>} : memref<160x32xf32, #tpu.memory_space<vmem>>, vector<8x32xf32>
    %36 = arith.addf %34, %35 : vector<8x32xf32>
    %c1 = arith.constant 1 : index
    %c0_21 = arith.constant 0 : index
    %37 = tpu.strided_load %arg11[%c1, %c0_21] {strides = array<i32: 20, 1>} : memref<160x32xf32, #tpu.memory_space<vmem>>, vector<8x32xf32>
    %38 = arith.addf %36, %37 : vector<8x32xf32>
    %c2 = arith.constant 2 : index
    %c0_22 = arith.constant 0 : index
    %39 = tpu.strided_load %arg11[%c2, %c0_22] {strides = array<i32: 20, 1>} : memref<160x32xf32, #tpu.memory_space<vmem>>, vector<8x32xf32>
    %40 = arith.addf %38, %39 : vector<8x32xf32>
    %c3 = arith.constant 3 : index
    %c0_23 = arith.constant 0 : index
    %41 = tpu.strided_load %arg11[%c3, %c0_23] {strides = array<i32: 20, 1>} : memref<160x32xf32, #tpu.memory_space<vmem>>, vector<8x32xf32>
    %42 = arith.addf %40, %41 : vector<8x32xf32>
    %c4 = arith.constant 4 : index
    %c0_24 = arith.constant 0 : index
    %43 = tpu.strided_load %arg11[%c4, %c0_24] {strides = array<i32: 20, 1>} : memref<160x32xf32, #tpu.memory_space<vmem>>, vector<8x32xf32>
    %44 = arith.addf %42, %43 : vector<8x32xf32>
    %c5 = arith.constant 5 : index
    %c0_25 = arith.constant 0 : index
    %45 = tpu.strided_load %arg11[%c5, %c0_25] {strides = array<i32: 20, 1>} : memref<160x32xf32, #tpu.memory_space<vmem>>, vector<8x32xf32>
    %46 = arith.addf %44, %45 : vector<8x32xf32>
    %c6 = arith.constant 6 : index
    %c0_26 = arith.constant 0 : index
    %47 = tpu.strided_load %arg11[%c6, %c0_26] {strides = array<i32: 20, 1>} : memref<160x32xf32, #tpu.memory_space<vmem>>, vector<8x32xf32>
    %48 = arith.addf %46, %47 : vector<8x32xf32>
    %c7 = arith.constant 7 : index
    %c0_27 = arith.constant 0 : index
    %49 = tpu.strided_load %arg11[%c7, %c0_27] {strides = array<i32: 20, 1>} : memref<160x32xf32, #tpu.memory_space<vmem>>, vector<8x32xf32>
    %50 = arith.addf %48, %49 : vector<8x32xf32>
    %c8 = arith.constant 8 : index
    %c0_28 = arith.constant 0 : index
    %51 = tpu.strided_load %arg11[%c8, %c0_28] {strides = array<i32: 20, 1>} : memref<160x32xf32, #tpu.memory_space<vmem>>, vector<8x32xf32>
    %52 = arith.addf %50, %51 : vector<8x32xf32>
    %c9 = arith.constant 9 : index
    %c0_29 = arith.constant 0 : index
    %53 = tpu.strided_load %arg11[%c9, %c0_29] {strides = array<i32: 20, 1>} : memref<160x32xf32, #tpu.memory_space<vmem>>, vector<8x32xf32>
    %54 = arith.addf %52, %53 : vector<8x32xf32>
    %c10 = arith.constant 10 : index
    %c0_30 = arith.constant 0 : index
    %55 = tpu.strided_load %arg11[%c10, %c0_30] {strides = array<i32: 20, 1>} : memref<160x32xf32, #tpu.memory_space<vmem>>, vector<8x32xf32>
    %56 = arith.addf %54, %55 : vector<8x32xf32>
    %c11 = arith.constant 11 : index
    %c0_31 = arith.constant 0 : index
    %57 = tpu.strided_load %arg11[%c11, %c0_31] {strides = array<i32: 20, 1>} : memref<160x32xf32, #tpu.memory_space<vmem>>, vector<8x32xf32>
    %58 = arith.addf %56, %57 : vector<8x32xf32>
    %c12 = arith.constant 12 : index
    %c0_32 = arith.constant 0 : index
    %59 = tpu.strided_load %arg11[%c12, %c0_32] {strides = array<i32: 20, 1>} : memref<160x32xf32, #tpu.memory_space<vmem>>, vector<8x32xf32>
    %60 = arith.addf %58, %59 : vector<8x32xf32>
    %c13 = arith.constant 13 : index
    %c0_33 = arith.constant 0 : index
    %61 = tpu.strided_load %arg11[%c13, %c0_33] {strides = array<i32: 20, 1>} : memref<160x32xf32, #tpu.memory_space<vmem>>, vector<8x32xf32>
    %62 = arith.addf %60, %61 : vector<8x32xf32>
    %c14 = arith.constant 14 : index
    %c0_34 = arith.constant 0 : index
    %63 = tpu.strided_load %arg11[%c14, %c0_34] {strides = array<i32: 20, 1>} : memref<160x32xf32, #tpu.memory_space<vmem>>, vector<8x32xf32>
    %64 = arith.addf %62, %63 : vector<8x32xf32>
    %c15 = arith.constant 15 : index
    %c0_35 = arith.constant 0 : index
    %65 = tpu.strided_load %arg11[%c15, %c0_35] {strides = array<i32: 20, 1>} : memref<160x32xf32, #tpu.memory_space<vmem>>, vector<8x32xf32>
    %66 = arith.addf %64, %65 : vector<8x32xf32>
    %c16 = arith.constant 16 : index
    %c0_36 = arith.constant 0 : index
    %67 = tpu.strided_load %arg11[%c16, %c0_36] {strides = array<i32: 20, 1>} : memref<160x32xf32, #tpu.memory_space<vmem>>, vector<8x32xf32>
    %68 = arith.addf %66, %67 : vector<8x32xf32>
    %c17 = arith.constant 17 : index
    %c0_37 = arith.constant 0 : index
    %69 = tpu.strided_load %arg11[%c17, %c0_37] {strides = array<i32: 20, 1>} : memref<160x32xf32, #tpu.memory_space<vmem>>, vector<8x32xf32>
    %70 = arith.addf %68, %69 : vector<8x32xf32>
    %c18 = arith.constant 18 : index
    %c0_38 = arith.constant 0 : index
    %71 = tpu.strided_load %arg11[%c18, %c0_38] {strides = array<i32: 20, 1>} : memref<160x32xf32, #tpu.memory_space<vmem>>, vector<8x32xf32>
    %72 = arith.addf %70, %71 : vector<8x32xf32>
    %c19 = arith.constant 19 : index
    %c0_39 = arith.constant 0 : index
    %73 = tpu.strided_load %arg11[%c19, %c0_39] {strides = array<i32: 20, 1>} : memref<160x32xf32, #tpu.memory_space<vmem>>, vector<8x32xf32>
    %74 = arith.addf %72, %73 : vector<8x32xf32>
    %cst_40 = arith.constant 5.000000e-02 : f32
    %75 = vector.broadcast %cst_40 : f32 to vector<8x32xf32>
    %76 = arith.mulf %74, %75 : vector<8x32xf32>
    %77 = tpu.concatenate %13, %21, %76 in 0 : vector<8x32xf32>, vector<8x32xf32>, vector<8x32xf32> -> vector<24x32xf32>
    %c0_41 = arith.constant 0 : index
    %c0_42 = arith.constant 0 : index
    %78 = vector.load %arg8[%c0_41, %c0_42] : memref<32x2xf32, #tpu.memory_space<vmem>>, vector<32x2xf32>
    %cst_43 = arith.constant dense<0.000000e+00> : vector<24x2xf32>
    %79 = tpu.matmul %77, %78, %cst_43 {dimension_numbers = #tpu.dot_dimension_numbers<[1], [0], [0], [1], [0, 0, 1, 1], [], []>} : vector<24x32xf32>, vector<32x2xf32>, vector<24x2xf32> -> vector<24x2xf32>
    %c0_44 = arith.constant 0 : index
    %c0_45 = arith.constant 0 : index
    %80 = vector.load %arg9[%c0_44, %c0_45] : memref<1x2xf32, #tpu.memory_space<vmem>>, vector<1x2xf32>
    %81 = vector.broadcast %80 : vector<1x2xf32> to vector<24x2xf32>
    %82 = arith.addf %79, %81 : vector<24x2xf32>
    %83 = vector.extract_strided_slice %82 {offsets = [0, 0], sizes = [8, 1], strides = [1, 1]} : vector<24x2xf32> to vector<8x1xf32>
    %84 = vector.extract_strided_slice %82 {offsets = [8, 1], sizes = [8, 1], strides = [1, 1]} : vector<24x2xf32> to vector<8x1xf32>
    %85 = vector.extract_strided_slice %82 {offsets = [16, 1], sizes = [8, 1], strides = [1, 1]} : vector<24x2xf32> to vector<8x1xf32>
    %86 = arith.subf %84, %85 : vector<8x1xf32>
    %87 = arith.addf %86, %83 : vector<8x1xf32>
    %c0_46 = arith.constant 0 : index
    %c0_47 = arith.constant 0 : index
    %88 = vector.load %arg10[%c0_46, %c0_47] : memref<8x1xf32, #tpu.memory_space<vmem>>, vector<8x1xf32>
    tpu.vector_store %arg10[%c0_46, %c0_47], %87 {strides = array<i32>} : memref<8x1xf32, #tpu.memory_space<vmem>>, vector<8x1xf32>,
    return
  }
}

</mosaic_0001>

<bundles_post_ra>
// kernel: tpu_custom_call.1
= control target key start
LH: loop header
LB: loop body
LE: loop exit
PB: predicated region body
PF: predicated region fallthrough
CT: control target
= control target key end

     0   :  { %v121_v0 = vlaneseq  ;;  %vm42_vm0 = vcmask 130048   ;;  %v693_v29 = vmov 0   ;;  %s694_s15 = smov 32   ;;  %vm75_vm1 = vcmask 261120   ;;  %s934_s3 = inlined_call_operand.vmem [shape: f32[16,32], index: 3, kind: input, shape index: {}]   ;;  %s935_s0 = inlined_call_operand.vmem [shape: f32[8,16], index: 0, kind: input, shape index: {}]   ;;  %s936_s2 = inlined_call_operand.vmem [shape: f32[20,8], index: 2, kind: input, shape index: {}]   ;;  %s937_s7 = inlined_call_operand.vmem [shape: f32[1,32], index: 7, kind: input, shape index: {}]   ;;  %s938_s4 = inlined_call_operand.vmem [shape: f32[1,32], index: 4, kind: input, shape index: {}]   ;;  %s939_s1 = inlined_call_operand.vmem [shape: f32[8,1], index: 1, kind: input, shape index: {}]   ;;  %s940_s5 = inlined_call_operand.vmem [shape: f32[32,64], index: 5, kind: input, shape index: {}]   ;;  %s941_s6 = inlined_call_operand.vmem [shape: f32[1,64], index: 6, kind: input, shape index: {}]   ;;  %s942_s8 = inlined_call_operand.vmem [shape: f32[32,2], index: 8, kind: input, shape index: {}]   ;;  %s943_s9 = inlined_call_operand.vmem [shape: f32[1,2], index: 9, kind: input, shape index: {}]   ;;  %s944_s10 = inlined_call_operand.vmem [shape: f32[8,1], index: 10, kind: output, shape index: {}]  }
   0x1   :  { %v37_v1 = vld [vmem:[%s934_s3 + $0x8] sm:$0xff]  ;;  %v36_v3 = vld [vmem:[%s934_s3] sm:$0xff]  ;;  %v119_v13 = vld [vmem:[%s936_s2 + $0x10] sm:$0xf]  ;;  %s696_s3 = smov 1   ;;  %vm615_vm2 = vcmask 7168  }
   0x2   :  { %60 = vmatpush.msra.mxu0 %v37_v1  ;;  %v122_v2 = vshrl.u32 %v121_v0, 7  ;;  %v35_v4 = vld [vmem:[%s935_s0] sm:$0xff]  ;;  %v118_v5 = vld [vmem:[%s936_s2 + $0x8] sm:$0xff]  ;;  %v239_v14 = vperm.slane %v119_v13, 1  ;;  %v246_v18 = vperm.slane %v119_v13, 2  ;;  %v232_v25 = vperm.slane %v119_v13, 0 }
   0x3   :  { %v117_v6 = vld [vmem:[%s936_s2] sm:$0xff]  ;;  %v190_v7 = vperm.slane %v118_v5, 2  ;;  %v204_v10 = vperm.slane %v118_v5, 4  ;;  %v225_v16 = vperm.slane %v118_v5, 7  ;;  %v211_v17 = vperm.slane %v118_v5, 5  ;;  %v70_v30 = vld [vmem:[%s940_s5 + $0x18] sm:$0xff] }
   0x4   :  { %641 = vset.pattern.permute.xlu2 %v122_v2  ;;  %640 = vset.pattern.permute.xlu1 %v122_v2  ;;  %v155_v8 = vperm.slane %v117_v6, 5  ;;  %v120_v9 = vperm.slane %v117_v6, 0  ;;  %v169_v11 = vperm.slane %v117_v6, 7  ;;  %v134_v12 = vperm.slane %v117_v6, 2  ;;  %v101_v28 = vld [vmem:[%s939_s1] sm:$0xff]  ;;  %v69_v32 = vld [vmem:[%s940_s5 + $0x10] sm:$0xff] }
   0x5   :  { %639 = vset.pattern.permute.xlu0 %v122_v2  ;;  %61 = vmatpush.msra.mxu0 %v36_v3  ;;  %v141_v15 = vperm.slane %v117_v6, 3  ;;  %v176_v19 = vperm.slane %v118_v5, 0  ;;  %v162_v20 = vperm.slane %v117_v6, 6  ;;  %v197_v21 = vperm.slane %v118_v5, 3  ;;  %v68_v33 = vld [vmem:[%s940_s5 + $0x8] sm:$0xff]  ;;  %v67_v34 = vld [vmem:[%s940_s5] sm:$0xff] }
   0x6   :  { %621 = vmatmul.msk.f32.vlgmr.msra.gmra.mxu0 %vm42_vm0, %v35_v4  ;;  %v127_v22 = vperm.slane %v117_v6, 1  ;;  %v148_v23 = vperm.slane %v117_v6, 4  ;;  %v183_v24 = vperm.slane %v118_v5, 1  ;;  %v253_v26 = vperm.slane %v119_v13, 3  ;;  %91 = vmatpush.msra.mxu1 %v70_v30  ;;  %v789_v37 = vld [vmem:[%s937_s7] ss:$0 sm:$0xff] }
   0x7   :  { %v218_v27 = vperm.slane %v118_v5, 6  ;;  %v644_v42 = vld [vmem:[%s938_s4] ss:$0 sm:$0xff] }
   0x8   :  { %92 = vmatpush.msra.mxu1 %v69_v32 }
   0xa   :  { %93 = vmatpush.msra.mxu1 %v68_v33 }
   0xc   :  { %195 = vperm.xlu2 %641, %v190_v7   ;;  %160 = vperm.xlu1 %640, %v155_v8  }
   0xd   :  { %125 = vperm.xlu0 %639, %v120_v9   ;;  %94 = vmatpush.msra.mxu1 %v67_v34 }
  0x14   :  { %209 = vperm.xlu2 %641, %v204_v10   ;;  %174 = vperm.xlu1 %640, %v169_v11  }
  0x15   :  { %139 = vperm.xlu0 %639, %v134_v12  }
  0x1c   :  { %244 = vperm.xlu1 %640, %v239_v14   ;;  %146 = vperm.xlu2 %641, %v141_v15  }
  0x1d   :  { %230 = vperm.xlu0 %639, %v225_v16  }
  0x24   :  { %216 = vperm.xlu1 %640, %v211_v17   ;;  %251 = vperm.xlu2 %641, %v246_v18   ;;  %v566_v17 = vld [vmem:[%s942_s8 + $0x18] sm:$0xff]  ;;  %v565_v18 = vld [vmem:[%s942_s8 + $0x10] sm:$0xff] }
  0x25   :  { %181 = vperm.xlu0 %639, %v176_v19   ;;  %591 = vmatpush.msrb.mxu0 %v566_v17  ;;  %v564_v19 = vld [vmem:[%s942_s8 + $0x8] sm:$0xff] }
  0x26   :  { %626 = vmatpush.msra.mxu2 %v566_v17  ;;  %627 = vmatpush.msra.mxu3 %v566_v17 }
  0x27   :  { %592 = vmatpush.msrb.mxu0 %v565_v18 }
  0x28   :  { %628 = vmatpush.msra.mxu2 %v565_v18  ;;  %629 = vmatpush.msra.mxu3 %v565_v18 }
  0x29   :  { %593 = vmatpush.msrb.mxu0 %v564_v19 }
  0x2a   :  { %630 = vmatpush.msra.mxu2 %v564_v19  ;;  %631 = vmatpush.msra.mxu3 %v564_v19 }
  0x2c   :  { %167 = vperm.xlu1 %640, %v162_v20   ;;  %202 = vperm.xlu2 %641, %v197_v21   ;;  %v563_v20 = vld [vmem:[%s942_s8] sm:$0xff] }
  0x2d   :  { %132 = vperm.xlu0 %639, %v127_v22   ;;  %594 = vmatpush.msrb.mxu0 %v563_v20 }
  0x2e   :  { %632 = vmatpush.msra.mxu2 %v563_v20  ;;  %633 = vmatpush.msra.mxu3 %v563_v20 }
  0x34   :  { %153 = vperm.xlu1 %640, %v148_v23   ;;  %188 = vperm.xlu2 %641, %v183_v24  }
  0x35   :  { %237 = vperm.xlu0 %639, %v232_v25   ;;  %v645_v25 = vld [vmem:[%s941_s6] ss:$0 sm:$0xff]  ;;  %s695_s6 = smov 96  }
  0x3c   :  { %258 = vperm.xlu1 %640, %v253_v26   ;;  %642 = vset.pattern.permute.xlu2 %v693_v29 }
  0x3d   :  { %223 = vperm.xlu0 %639, %v218_v27   ;;  %104 = vperm.xlu2 %642, %v101_v28  }
  0x66   :  { %v196_v31 = vpop.permute.xlu2 %195 }
  0x67   :  { %v270_v55 = vmul.f32 %v789_v37, %v196_v31 }
  0x6e   :  { %v210_v35 = vpop.permute.xlu2 %209 }
  0x6f   :  { %v272_v47 = vmul.f32 %v789_v37, %v210_v35 }
  0x76   :  { %v147_v36 = vpop.permute.xlu2 %146 }
  0x77   :  { %v263_v53 = vmul.f32 %v789_v37, %v147_v36 }
  0x7e   :  { %v161_v38 = vpop.permute.xlu1 %160  ;;  %v252_v39 = vpop.permute.xlu2 %251 }
  0x7f   :  { %v265_v40 = vmul.f32 %v789_v37, %v161_v38  ;;  %v126_v41 = vpop.permute.xlu0 %125  ;;  %v278_v58 = vmul.f32 %v789_v37, %v252_v39 }
  0x80   :  { %v260_v0 = vmul.f32 %v789_v37, %v126_v41 }
  0x81   :  { %310 = vrot.lane.b32.xlu1 %v265_v40, %s694_s15 }
  0x83   :  { %v63_v43 = vpop.f32.mrf.mxu0 }
  0x84   :  { %v64_v44 = vadd.f32 %v644_v42, %v63_v43 }
  0x86   :  { %647 = vtanh.f32 %v64_v44  ;;  %v175_v45 = vpop.permute.xlu1 %174  ;;  %v203_v46 = vpop.permute.xlu2 %202 }
  0x87   :  { %v140_v48 = vpop.permute.xlu0 %139  ;;  %v267_v5 = vmul.f32 %v789_v37, %v175_v45  ;;  %v271_v15 = vmul.f32 %v789_v37, %v203_v46 }
  0x88   :  { %v262_v49 = vmul.f32 %v789_v37, %v140_v48 }
  0x89   :  { %324 = vrot.lane.b32.xlu1 %v272_v47, %s694_s15 }
  0x8a   :  { %304 = vrot.lane.b32.xlu0 %v262_v49, %s694_s15 }
  0x8c   :  { %v648_v50 = vpop.eup %647 }
  0x8d   :  { %622 = vmatmul.msk.f32.vlgmr.msra.gmra.mxu1 %vm75_vm1, %v648_v50 }
  0x8e   :  { %v245_v51 = vpop.permute.xlu1 %244  ;;  %v189_v52 = vpop.permute.xlu2 %188 }
  0x8f   :  { %v231_v54 = vpop.permute.xlu0 %230  ;;  %v277_v56 = vmul.f32 %v789_v37, %v245_v51  ;;  %v269_v16 = vmul.f32 %v789_v37, %v189_v52 }
  0x90   :  { %v275_v10 = vmul.f32 %v789_v37, %v231_v54 }
  0x91   :  { %306 = vrot.lane.b32.xlu1 %v263_v53, %s694_s15 }
  0x92   :  { %320 = vrot.lane.b32.xlu0 %v270_v55, %s694_s15 }
  0x96   :  { %v217_v57 = vpop.permute.xlu1 %216 }
  0x97   :  { %v182_v59 = vpop.permute.xlu0 %181  ;;  %v105_v60 = vpop.permute.xlu2 %104  ;;  %v273_v1 = vmul.f32 %v789_v37, %v217_v57 }
  0x98   :  { %v110_v61 = vmul.f32 %v789_v37, %v105_v60  ;;  %v268_v13 = vmul.f32 %v789_v37, %v182_v59 }
  0x99   :  { %336 = vrot.lane.b32.xlu1 %v278_v58, %s694_s15 }
  0x9a   :  { %334 = vrot.lane.b32.xlu0 %v277_v56, %s694_s15  ;;  %112 = vrot.lane.b32.xlu2 %v110_v61, %s694_s15 }
  0x9e   :  { %v168_v62 = vpop.permute.xlu1 %167 }
  0x9f   :  { %v266_v63 = vmul.f32 %v789_v37, %v168_v62  ;;  %v133_v2 = vpop.permute.xlu0 %132 }
  0xa0   :  { %v261_v6 = vmul.f32 %v789_v37, %v133_v2 }
  0xa1   :  { %312 = vrot.lane.b32.xlu1 %v266_v63, %s694_s15 }
  0xa2   :  { %326 = vrot.lane.b32.xlu0 %v273_v1, %s694_s15  ;;  %300 = vrot.lane.b32.xlu2 %v260_v0, %s694_s15 }
  0xa6   :  { %v154_v3 = vpop.permute.xlu1 %153 }
  0xa7   :  { %v264_v4 = vmul.f32 %v789_v37, %v154_v3  ;;  %v238_v7 = vpop.permute.xlu0 %237 }
  0xa8   :  { %v276_v11 = vmul.f32 %v789_v37, %v238_v7 }
  0xa9   :  { %308 = vrot.lane.b32.xlu1 %v264_v4, %s694_s15 }
  0xaa   :  { %302 = vrot.lane.b32.xlu0 %v261_v6, %s694_s15  ;;  %314 = vrot.lane.b32.xlu2 %v267_v5, %s694_s15 }
  0xae   :  { %v259_v8 = vpop.permute.xlu1 %258 }
  0xaf   :  { %v279_v9 = vmul.f32 %v789_v37, %v259_v8  ;;  %v224_v12 = vpop.permute.xlu0 %223 }
  0xb0   :  { %v274_v14 = vmul.f32 %v789_v37, %v224_v12 }
  0xb1   :  { %338 = vrot.lane.b32.xlu1 %v279_v9, %s694_s15 }
  0xb2   :  { %332 = vrot.lane.b32.xlu0 %v276_v11, %s694_s15  ;;  %330 = vrot.lane.b32.xlu2 %v275_v10, %s694_s15 }
  0xba   :  { %328 = vrot.lane.b32.xlu0 %v274_v14, %s694_s15  ;;  %316 = vrot.lane.b32.xlu2 %v268_v13, %s694_s15 }
  0xc2   :  { %322 = vrot.lane.b32.xlu2 %v271_v15, %s694_s15 }
  0xca   :  { %318 = vrot.lane.b32.xlu2 %v269_v16, %s694_s15 }
  0xf3   :  { %v311_v22 = vpop.permute.xlu1 %310 }
  0xf4   :  { %v849_v21 = vpop.permute.xlu2 %112 }
  0xfb   :  { %v325_v26 = vpop.permute.xlu1 %324 }
  0xfc   :  { %v305_v23 = vpop.permute.xlu0 %304  ;;  %v301_v24 = vpop.permute.xlu2 %300 }
 0x103   :  { %v307_v35 = vpop.permute.xlu1 %306 }
 0x104   :  { %v321_v28 = vpop.permute.xlu0 %320  ;;  %v315_v29 = vpop.permute.xlu2 %314 }
 0x10a   :  { %v96_v27 = vpop.f32.mrf.mxu1 }
 0x10b   :  { %v854_v30 = vadd.f32 %v645_v25, %v96_v27  ;;  %v337_v44 = vpop.permute.xlu1 %336 }
 0x10c   :  { %v335_v36 = vpop.permute.xlu0 %334  ;;  %v331_v37 = vpop.permute.xlu2 %330 }
 0x10d   :  { %649 = vtanh.f32 %v854_v30  ;;  %v365_v31 = vadd.f32 %v311_v22, %v854_v30  ;;  %v362_v32 = vadd.f32 %v305_v23, %v854_v30  ;;  %v360_v33 = vadd.f32 %v301_v24, %v854_v30 }
 0x10e   :  { %v372_v38 = vadd.f32 %v325_v26, %v854_v30  ;;  %v370_v39 = vadd.f32 %v321_v28, %v854_v30  ;;  %v367_v41 = vadd.f32 %v315_v29, %v854_v30  ;;  %v363_v45 = vadd.f32 %v307_v35, %v854_v30 }
 0x10f   :  { %651 = vtanh.f32 %v365_v31  ;;  %v377_v46 = vadd.f32 %v335_v36, %v854_v30  ;;  %v375_v50 = vadd.f32 %v331_v37, %v854_v30  ;;  %v378_v53 = vadd.f32 %v337_v44, %v854_v30 }
 0x110   :  { %653 = vtanh.f32 %v362_v32  ;;  %v115_v15 = vadd.f32 %v849_v21, %v854_v30 }
 0x111   :  { %655 = vtanh.f32 %v360_v33 }
 0x112   :  { %657 = vtanh.f32 %v372_v38 }
 0x113   :  { %v650_v34 = vpop.eup %649  ;;  %659 = vtanh.f32 %v370_v39  ;;  %v313_v56 = vpop.permute.xlu1 %312 }
 0x114   :  { %623 = vmatmul.msk.f32.vlgmr.msrb.gmra.mxu0 %vm75_vm1, %v650_v34  ;;  %661 = vtanh.f32 %v367_v41  ;;  %v327_v47 = vpop.permute.xlu0 %326  ;;  %v317_v48 = vpop.permute.xlu2 %316  ;;  %v366_v63 = vadd.f32 %v313_v56, %v854_v30 }
 0x115   :  { %v652_v40 = vpop.eup %651  ;;  %663 = vtanh.f32 %v363_v45  ;;  %v373_v54 = vadd.f32 %v327_v47, %v854_v30  ;;  %v368_v57 = vadd.f32 %v317_v48, %v854_v30 }
 0x116   :  { %v654_v42 = vpop.eup %653  ;;  %430 = vrot.lane.b32.xlu2 %v652_v40, %s695_s6  ;;  %665 = vtanh.f32 %v377_v46 }
 0x117   :  { %v656_v43 = vpop.eup %655  ;;  %424 = vrot.lane.b32.xlu1 %v654_v42, %s695_s6  ;;  %667 = vtanh.f32 %v375_v50 }
 0x118   :  { %420 = vrot.lane.b32.xlu0 %v656_v43, %s695_s6  ;;  %v658_v49 = vpop.eup %657  ;;  %669 = vtanh.f32 %v378_v53 }
 0x119   :  { %v660_v51 = vpop.eup %659  ;;  %671 = vtanh.f32 %v373_v54 }
 0x11a   :  { %v662_v52 = vpop.eup %661  ;;  %673 = vtanh.f32 %v368_v57 }
 0x11b   :  { %v664_v55 = vpop.eup %663  ;;  %v309_v4 = vpop.permute.xlu1 %308 }
 0x11c   :  { %v666_v58 = vpop.eup %665  ;;  %v303_v59 = vpop.permute.xlu0 %302  ;;  %v364_v8 = vadd.f32 %v309_v4, %v854_v30 }
 0x11d   :  { %v323_v60 = vpop.permute.xlu2 %322  ;;  %v668_v61 = vpop.eup %667  ;;  %v361_v1 = vadd.f32 %v303_v59, %v854_v30 }
 0x11e   :  { %444 = vrot.lane.b32.xlu2 %v658_v49, %s695_s6  ;;  %v371_v62 = vadd.f32 %v323_v60, %v854_v30  ;;  %v670_v0 = vpop.eup %669 }
 0x11f   :  { %440 = vrot.lane.b32.xlu1 %v660_v51, %s695_s6  ;;  %v672_v2 = vpop.eup %671 }
 0x120   :  { %434 = vrot.lane.b32.xlu0 %v662_v52, %s695_s6  ;;  %v674_v3 = vpop.eup %673  ;;  %675 = vtanh.f32 %v371_v62 }
 0x121   :  { %677 = vtanh.f32 %v366_v63 }
 0x122   :  { %679 = vtanh.f32 %v361_v1 }
 0x123   :  { %v339_v13 = vpop.permute.xlu1 %338 }
 0x124   :  { %v333_v5 = vpop.permute.xlu0 %332  ;;  %v379_v16 = vadd.f32 %v339_v13, %v854_v30 }
 0x125   :  { %v319_v6 = vpop.permute.xlu2 %318  ;;  %v376_v10 = vadd.f32 %v333_v5, %v854_v30 }
 0x126   :  { %426 = vrot.lane.b32.xlu2 %v664_v55, %s695_s6  ;;  %v369_v7 = vadd.f32 %v319_v6, %v854_v30  ;;  %v676_v9 = vpop.eup %675 }
 0x127   :  { %454 = vrot.lane.b32.xlu1 %v666_v58, %s695_s6  ;;  %v678_v11 = vpop.eup %677 }
 0x128   :  { %450 = vrot.lane.b32.xlu0 %v668_v61, %s695_s6  ;;  %v680_v12 = vpop.eup %679  ;;  %681 = vtanh.f32 %v369_v7 }
 0x129   :  { %683 = vtanh.f32 %v364_v8 }
 0x12a   :  { %685 = vtanh.f32 %v376_v10 }
 0x12b   :  { %687 = vtanh.f32 %v115_v15 }
 0x12c   :  { %v329_v14 = vpop.permute.xlu0 %328  ;;  %689 = vtanh.f32 %v379_v16 }
 0x12d   :  { %v374_v18 = vadd.f32 %v329_v14, %v854_v30  ;;  %v910_v30 = vld [vmem:[%s943_s9] ss:$0 sm:$0xff]  ;;  %s697_s9 = smov 127  }
 0x12e   :  { %456 = vrot.lane.b32.xlu2 %v670_v0, %s695_s6  ;;  %v682_v17 = vpop.eup %681 }
 0x12f   :  { %446 = vrot.lane.b32.xlu1 %v672_v2, %s695_s6  ;;  %v684_v19 = vpop.eup %683  ;;  %691 = vtanh.f32 %v374_v18 }
 0x130   :  { %436 = vrot.lane.b32.xlu0 %v674_v3, %s695_s6  ;;  %v686_v20 = vpop.eup %685 }
 0x131   :  { %v688_v22 = vpop.eup %687 }
 0x132   :  { %v690_v23 = vpop.eup %689 }
 0x135   :  { %v692_v21 = vpop.eup %691 }
 0x136   :  { %442 = vrot.lane.b32.xlu2 %v676_v9, %s695_s6 }
 0x137   :  { %432 = vrot.lane.b32.xlu1 %v678_v11, %s695_s6 }
 0x138   :  { %422 = vrot.lane.b32.xlu0 %v680_v12, %s695_s6 }
 0x13e   :  { %438 = vrot.lane.b32.xlu2 %v682_v17, %s695_s6 }
 0x13f   :  { %428 = vrot.lane.b32.xlu1 %v684_v19, %s695_s6 }
 0x140   :  { %452 = vrot.lane.b32.xlu0 %v686_v20, %s695_s6 }
 0x146   :  { %561 = vrot.lane.b32.xlu2 %v688_v22, %s695_s6 }
 0x147   :  { %458 = vrot.lane.b32.xlu1 %v690_v23, %s695_s6 }
 0x148   :  { %448 = vrot.lane.b32.xlu0 %v692_v21, %s695_s6 }
 0x170   :  { %v431_v24 = vpop.permute.xlu2 %430 }
 0x171   :  { %485 = vst.msk [vmem:[#allocation2 + $0x28] sm:$0xff] %vm75_vm1, %v431_v24 }
 0x178   :  { %v445_v25 = vpop.permute.xlu2 %444 }
 0x179   :  { %492 = vst.msk [vmem:[#allocation2 + $0x60] sm:$0xff] %vm75_vm1, %v445_v25 }
 0x180   :  { %v427_v26 = vpop.permute.xlu2 %426 }
 0x181   :  { %483 = vst.msk [vmem:[#allocation2 + $0x18] sm:$0xff] %vm75_vm1, %v427_v26 }
 0x188   :  { %v457_v27 = vpop.permute.xlu2 %456 }
 0x189   :  { %498 = vst.msk [vmem:[#allocation2 + $0x90] sm:$0xff] %vm75_vm1, %v457_v27  ;;  %v425_v28 = vpop.permute.xlu1 %424 }
 0x18a   :  { %482 = vst.msk [vmem:[#allocation2 + $0x10] sm:$0xff] %vm75_vm1, %v425_v28  ;;  %v421_v29 = vpop.permute.xlu0 %420 }
 0x18b   :  { %480 = vst.msk [vmem:[#allocation2] sm:$0xff] %vm75_vm1, %v421_v29 }
 0x190   :  { %v443_v33 = vpop.permute.xlu2 %442 }
 0x191   :  { %v596_v31 = vpop.f32.mrf.mxu0  ;;  %491 = vst.msk [vmem:[#allocation2 + $0x58] sm:$0xff] %vm75_vm1, %v443_v33  ;;  %v441_v34 = vpop.permute.xlu1 %440 }
 0x192   :  { %v597_v32 = vadd.f32 %v910_v30, %v596_v31  ;;  %490 = vst.msk [vmem:[#allocation2 + $0x50] sm:$0xff] %vm75_vm1, %v441_v34  ;;  %v435_v35 = vpop.permute.xlu0 %434 }
 0x193   :  { %487 = vst.msk [vmem:[#allocation2 + $0x38] sm:$0xff] %vm75_vm1, %v435_v35 }
 0x194   :  { %607 = vrot.lane.b32.xlu0 %v597_v32, %s696_s3 }
 0x198   :  { %v439_v36 = vpop.permute.xlu2 %438 }
 0x199   :  { %489 = vst.msk [vmem:[#allocation2 + $0x48] sm:$0xff] %vm75_vm1, %v439_v36  ;;  %v455_v37 = vpop.permute.xlu1 %454 }
 0x19a   :  { %497 = vst.msk [vmem:[#allocation2 + $0x88] sm:$0xff] %vm75_vm1, %v455_v37  ;;  %v451_v38 = vpop.permute.xlu0 %450 }
 0x19b   :  { %495 = vst.msk [vmem:[#allocation2 + $0x78] sm:$0xff] %vm75_vm1, %v451_v38 }
 0x1a0   :  { %v562_v39 = vpop.permute.xlu2 %561 }
 0x1a1   :  { %v447_v40 = vpop.permute.xlu1 %446  ;;  %624 = vmatmul.msk.f32.vlgmr.msra.gmra.mxu2 %vm75_vm1, %v562_v39 }
 0x1a2   :  { %v500_v41 = vld [vmem:[#allocation2] ss:$20 sm:$0xff]  ;;  %v503_v42 = vld [vmem:[#allocation2 + $0x1] ss:$20 sm:$0xff]  ;;  %v437_v43 = vpop.permute.xlu0 %436  ;;  %493 = vst.msk [vmem:[#allocation2 + $0x68] sm:$0xff] %vm75_vm1, %v447_v40 }
 0x1a3   :  { %v504_v44 = vadd.f32 %v503_v42, %v500_v41  ;;  %488 = vst.msk [vmem:[#allocation2 + $0x40] sm:$0xff] %vm75_vm1, %v437_v43  ;;  %v506_v45 = vld [vmem:[#allocation2 + $0x2] ss:$20 sm:$0xff]  ;;  %v509_v48 = vld [vmem:[#allocation2 + $0x3] ss:$20 sm:$0xff] }
 0x1a5   :  { %v507_v46 = vadd.f32 %v506_v45, %v504_v44 }
 0x1a7   :  { %v510_v50 = vadd.f32 %v509_v48, %v507_v46 }
 0x1a9   :  { %v433_v47 = vpop.permute.xlu1 %432 }
 0x1aa   :  { %486 = vst.msk [vmem:[#allocation2 + $0x30] sm:$0xff] %vm75_vm1, %v433_v47  ;;  %v423_v49 = vpop.permute.xlu0 %422  ;;  %v512_v51 = vld [vmem:[#allocation2 + $0x4] ss:$20 sm:$0xff]  ;;  %v515_v53 = vld [vmem:[#allocation2 + $0x5] ss:$20 sm:$0xff] }
 0x1ab   :  { %481 = vst.msk [vmem:[#allocation2 + $0x8] sm:$0xff] %vm75_vm1, %v423_v49  ;;  %v513_v52 = vadd.f32 %v512_v51, %v510_v50  ;;  %v518_v57 = vld [vmem:[#allocation2 + $0x6] ss:$20 sm:$0xff]  ;;  %v521_v59 = vld [vmem:[#allocation2 + $0x7] ss:$20 sm:$0xff] }
 0x1ad   :  { %v516_v55 = vadd.f32 %v515_v53, %v513_v52 }
 0x1af   :  { %v519_v58 = vadd.f32 %v518_v57, %v516_v55 }
 0x1b1   :  { %v429_v54 = vpop.permute.xlu1 %428  ;;  %v522_v61 = vadd.f32 %v521_v59, %v519_v58 }
 0x1b2   :  { %484 = vst.msk [vmem:[#allocation2 + $0x20] sm:$0xff] %vm75_vm1, %v429_v54  ;;  %v453_v56 = vpop.permute.xlu0 %452 }
 0x1b3   :  { %496 = vst.msk [vmem:[#allocation2 + $0x80] sm:$0xff] %vm75_vm1, %v453_v56 }
 0x1b9   :  { %v459_v60 = vpop.permute.xlu1 %458 }
 0x1ba   :  { %499 = vst.msk [vmem:[#allocation2 + $0x98] sm:$0xff] %vm75_vm1, %v459_v60  ;;  %v449_v62 = vpop.permute.xlu0 %448  ;;  %v524_v63 = vld [vmem:[#allocation2 + $0x8] ss:$20 sm:$0xff]  ;;  %v527_v1 = vld [vmem:[#allocation2 + $0x9] ss:$20 sm:$0xff] }
 0x1bb   :  { %494 = vst.msk [vmem:[#allocation2 + $0x70] sm:$0xff] %vm75_vm1, %v449_v62  ;;  %v525_v0 = vadd.f32 %v524_v63, %v522_v61  ;;  %v530_v3 = vld [vmem:[#allocation2 + $0xa] ss:$20 sm:$0xff]  ;;  %v533_v5 = vld [vmem:[#allocation2 + $0xb] ss:$20 sm:$0xff] }
 0x1bd   :  { %v528_v2 = vadd.f32 %v527_v1, %v525_v0 }
 0x1bf   :  { %v531_v4 = vadd.f32 %v530_v3, %v528_v2 }
 0x1c1   :  { %v534_v6 = vadd.f32 %v533_v5, %v531_v4 }
 0x1c2   :  { %v536_v7 = vld [vmem:[#allocation2 + $0xc] ss:$20 sm:$0xff]  ;;  %v539_v9 = vld [vmem:[#allocation2 + $0xd] ss:$20 sm:$0xff]  ;;  %v542_v11 = vld [vmem:[#allocation2 + $0xe] ss:$20 sm:$0xff] }
 0x1c3   :  { %v537_v8 = vadd.f32 %v536_v7, %v534_v6  ;;  %v545_v13 = vld [vmem:[#allocation2 + $0xf] ss:$20 sm:$0xff]  ;;  %v548_v15 = vld [vmem:[#allocation2 + $0x10] ss:$20 sm:$0xff]  ;;  %v551_v17 = vld [vmem:[#allocation2 + $0x11] ss:$20 sm:$0xff] }
 0x1c4   :  { %v554_v19 = vld [vmem:[#allocation2 + $0x12] ss:$20 sm:$0xff]  ;;  %v557_v22 = vld [vmem:[#allocation2 + $0x13] ss:$20 sm:$0xff] }
 0x1c5   :  { %v540_v10 = vadd.f32 %v539_v9, %v537_v8 }
 0x1c7   :  { %v543_v12 = vadd.f32 %v542_v11, %v540_v10 }
 0x1c9   :  { %v546_v14 = vadd.f32 %v545_v13, %v543_v12 }
 0x1cb   :  { %v549_v16 = vadd.f32 %v548_v15, %v546_v14 }
 0x1cd   :  { %v552_v18 = vadd.f32 %v551_v17, %v549_v16 }
 0x1cf   :  { %v555_v20 = vadd.f32 %v554_v19, %v552_v18 }
 0x1d1   :  { %v558_v23 = vadd.f32 %v557_v22, %v555_v20 }
 0x1d3   :  { %v559_v21 = vmul.f32 0.05, %v558_v23 }
 0x1d5   :  { %625 = vmatmul.msk.f32.vlgmr.msra.gmra.mxu3 %vm75_vm1, %v559_v21 }
 0x206   :  { %v608_v29 = vpop.permute.xlu0 %607 }
 0x224   :  { %v599_v24 = vpop.f32.mrf.mxu2 }
 0x225   :  { %v600_v26 = vadd.f32 %v910_v30, %v599_v24 }
 0x258   :  { %v602_v25 = vpop.f32.mrf.mxu3 }
 0x259   :  { %v603_v27 = vadd.f32 %v910_v30, %v602_v25 }
 0x25b   :  { %v605_v28 = vsub.f32 %v600_v26, %v603_v27 }
 0x25d   :  { %v610_v31 = vadd.f32 %v608_v29, %v605_v28 }
 0x25f   :  { %612 = vrot.lane.b32.xlu1 %v610_v31, %s697_s9 }
 0x2d1   :  { %v613_v32 = vpop.permute.xlu1 %612 }
 0x2d2   :  { %616 = vst.msk [vmem:[%s944_s10] sm:$0xff] %vm615_vm2, %v613_v32 }

</bundles_post_ra>
